<compile_context>
chip_gen: v7x
topology: tpu7x:2x2x1
jax: 0.10.0
libtpu: 0.0.40
codegen_flags: <defaults>
</compile_context>

<pallas_src>
import jax
import jax.numpy as jnp
from jax import lax
from jax.experimental import pallas as pl
from jax.experimental.pallas import tpu as pltpu


# ----------------------------------------------------------------------------
# Fused multi-layer LSTM kernel.  Grid iterates sequentially over time blocks;
# the per-layer (h, c) recurrence is carried across grid steps in VMEM scratch.
# ----------------------------------------------------------------------------
def _lstm_stack_kernel(x_ref, wx_ref, wh_ref, b_ref,
                       out_ref, hT_ref, cT_ref,
                       h_scr, c_scr, act_scr, gx_scr):
    g = pl.program_id(0)
    tt = x_ref.shape[0]                 # time steps in this block (static)
    L = wx_ref.shape[0]
    G = wx_ref.shape[2]
    B = h_scr.shape[1]
    H = h_scr.shape[2]

    @pl.when(g == 0)
    def _init():
        h_scr[...] = jnp.zeros_like(h_scr)
        c_scr[...] = jnp.zeros_like(c_scr)

    # Static Python loop over layers (layer-major; time-minor inside).
    for l in range(L):
        src = x_ref if l == 0 else act_scr          # (tt, B, Din)
        dst = out_ref if l == L - 1 else act_scr    # (tt, B, H)

        wx = wx_ref[l]                               # (Din, 4H) -- invariant
        wh = wh_ref[l]                               # (H,   4H)
        b = b_ref[l]                                 # (1,   4H)
        din = wx.shape[0]

        # Hoisted input projection: one big MXU matmul for the whole block,
        # off the sequential critical path.  f/i/o columns are pre-scaled by
        # 0.5 in the wrapper so a single tanh below realizes the sigmoids.
        x_blk = src[...].reshape(tt * B, din)
        gx_scr[...] = (jnp.dot(x_blk, wx, preferred_element_type=jnp.float32)
                       + b).reshape(tt, B, G)

        def step(t, carry):
            h_prev, c_prev = carry
            gates = gx_scr[t] + jnp.dot(h_prev, wh,
                                        preferred_element_type=jnp.float32)
            th = jnp.tanh(gates)                     # one EUP pass over 4H
            f_t = 0.5 * th[:, 0 * H:1 * H] + 0.5     # sigmoid via tanh
            i_t = 0.5 * th[:, 1 * H:2 * H] + 0.5
            c_hat = th[:, 2 * H:3 * H]
            o_t = 0.5 * th[:, 3 * H:4 * H] + 0.5
            c_new = f_t * c_prev + i_t * c_hat
            h_new = o_t * jnp.tanh(c_new)
            dst[t] = h_new
            return h_new, c_new

        h_last, c_last = lax.fori_loop(0, tt, step,
                                       (h_scr[l], c_scr[l]), unroll=True)
        h_scr[l] = h_last
        c_scr[l] = c_last

    # Final state: write only once, on the last grid step.
    @pl.when(g == pl.num_programs(0) - 1)
    def _final():
        hT_ref[...] = h_scr[...]
        cT_ref[...] = c_scr[...]


def _pick_time_block(T, max_tt=32):
    """Largest divisor of T that is <= max_tt (keeps the grid exact)."""
    for tt in range(min(T, max_tt), 0, -1):
        if T % tt == 0:
            return tt
    return 1


def _pack_params(params, input_size):
    """Pack per-layer gate weights into fused, pre-scaled slabs.

    Returns Wx (L, Din, 4H), Wh (L, H, 4H), b (L, 1, 4H) with gate order
    [f | i | c | o] and the f/i/o columns scaled by 0.5 so that
    sigmoid(g) == 0.5 * tanh(g_scaled) + 0.5.
    """
    H = params[0]["W_f"].shape[0]
    G = 4 * H
    half = jnp.full((H,), 0.5, jnp.float32)
    one = jnp.ones((H,), jnp.float32)
    scale = jnp.concatenate([half, half, one, half])            # (4H,)

    Wx_list, Wh_list, b_list = [], [], []
    for l, p in enumerate(params):
        din = input_size if l == 0 else H
        # W_* are (H, Din+H) with combined feature order [x (Din), h (H)].
        Wcat = jnp.concatenate(
            [p["W_f"].T, p["W_i"].T, p["W_c"].T, p["W_o"].T], axis=1)  # (Din+H, 4H)
        Wx_list.append(Wcat[:din, :] * scale)
        Wh_list.append(Wcat[din:, :] * scale)
        b_list.append(jnp.concatenate(
            [p["b_f"], p["b_i"], p["b_c"], p["b_o"]]).reshape(1, G) * scale)
    return jnp.stack(Wx_list), jnp.stack(Wh_list), jnp.stack(b_list)


def lstm_stack_pallas(x_tbi, Wx, Wh, b):
    """Run the whole fused layer stack.  x_tbi: (T, B, I) f32, B % 8 == 0."""
    T, B, I = x_tbi.shape
    L, Din, G = Wx.shape
    H = G // 4

    tt = _pick_time_block(T)
    grid = (T // tt,)

    # NOTE: for production sizes, cast Wx/Wh to bfloat16 and raise
    # vmem_limit_bytes via CompilerParams; kept f32 here for the tiny test.
    grid_spec = pltpu.PrefetchScalarGridSpec(
        num_scalar_prefetch=0,
        grid=grid,
        in_specs=[
            pl.BlockSpec((tt, B, I), lambda g: (g, 0, 0)),    # x time-block
            pl.BlockSpec((L, Din, G), lambda g: (0, 0, 0)),   # Wx (invariant)
            pl.BlockSpec((L, H, G), lambda g: (0, 0, 0)),     # Wh (invariant)
            pl.BlockSpec((L, 1, G), lambda g: (0, 0, 0)),     # fused bias
        ],
        out_specs=[
            pl.BlockSpec((tt, B, H), lambda g: (g, 0, 0)),    # hidden sequence
            pl.BlockSpec((L, B, H), lambda g: (0, 0, 0)),     # final h
            pl.BlockSpec((L, B, H), lambda g: (0, 0, 0)),     # final c
        ],
        scratch_shapes=[
            pltpu.VMEM((L, B, H), jnp.float32),               # h carry
            pltpu.VMEM((L, B, H), jnp.float32),               # c carry
            pltpu.VMEM((tt, B, H), jnp.float32),              # inter-layer acts
            pltpu.VMEM((tt, B, G), jnp.float32),              # hoisted x-proj
        ],
    )

    out_seq, h_T, c_T = pl.pallas_call(
        _lstm_stack_kernel,
        out_shape=(
            jax.ShapeDtypeStruct((T, B, H), jnp.float32),
            jax.ShapeDtypeStruct((L, B, H), jnp.float32),
            jax.ShapeDtypeStruct((L, B, H), jnp.float32),
        ),
        grid_spec=grid_spec,
        compiler_params=pltpu.CompilerParams(
            dimension_semantics=("arbitrary",)),              # sequential in time
    )(x_tbi, Wx, Wh, b)
    return out_seq, h_T, c_T


# ----------------------------------------------------------------------------
# Wrapper matching the PyTorch forward() (hidden=None path).
# ----------------------------------------------------------------------------
@jax.jit
def lstm_forward(x, params):
    """x: (B, T, I).  Returns (output (B,T,H), (h (L,B,H), c (L,B,H)))."""
    # TODO(synk): only the hidden=None initialization path is implemented.
    B, T, I = x.shape
    L = len(params)
    H = params[0]["W_f"].shape[0]
    if L > 1:
        # The reference module requires input_size == hidden_size for layers>1.
        assert I == H, "stacked layers require input_size == hidden_size"

    Bp = -(-B // 8) * 8                                     # pad batch to x8
    xs = jnp.transpose(x.astype(jnp.float32), (1, 0, 2))   # (T, B, I)
    if Bp != B:
        xs = jnp.pad(xs, ((0, 0), (0, Bp - B), (0, 0)))

    Wx, Wh, b = _pack_params(params, I)
    out_seq, h_T, c_T = lstm_stack_pallas(xs, Wx, Wh, b)

    out = jnp.transpose(out_seq, (1, 0, 2))[:B]             # (B, T, H)
    return out, (h_T[:, :B], c_T[:, :B])


# ----------------------------------------------------------------------------
# Pure-JAX reference (mirrors the PyTorch code 1:1) for correctness checking.
# ----------------------------------------------------------------------------
def lstm_forward_ref(x, params):
    B, T, _ = x.shape
    L = len(params)
    H = params[0]["W_f"].shape[0]
    ht = jnp.zeros((L, B, H), jnp.float32)
    ct = jnp.zeros((L, B, H), jnp.float32)
    outs = []
    for t in range(T):
        x_t = x[:, t, :]
        new_h, new_c = [], []
        for l, p in enumerate(params):
            comb = jnp.concatenate([x_t, ht[l]], axis=1)
            f = jax.nn.sigmoid((p["W_f"] @ comb.T + p["b_f"][:, None]).T)
            i = jax.nn.sigmoid((p["W_i"] @ comb.T + p["b_i"][:, None]).T)
            o = jax.nn.sigmoid((p["W_o"] @ comb.T + p["b_o"][:, None]).T)
            ch = jnp.tanh((p["W_c"] @ comb.T + p["b_c"][:, None]).T)
            c_new = f * ct[l] + i * ch
            h_new = o * jnp.tanh(c_new)
            new_c.append(c_new)
            new_h.append(h_new)
            x_t = h_new
        ht = jnp.stack(new_h, 0)
        ct = jnp.stack(new_c, 0)
        outs.append(ht[-1][:, None, :])
    return jnp.concatenate(outs, axis=1), (ht, ct)


def make_params(key, input_size, hidden_size, layers):
    params = []
    for _ in range(layers):
        key, *ks = jax.random.split(key, 9)
        p = {
            "W_f": jax.random.normal(ks[0], (hidden_size, hidden_size + input_size), jnp.float32),
            "b_f": jax.random.normal(ks[1], (hidden_size,), jnp.float32),
            "W_i": jax.random.normal(ks[2], (hidden_size, hidden_size + input_size), jnp.float32),
            "b_i": jax.random.normal(ks[3], (hidden_size,), jnp.float32),
            "W_c": jax.random.normal(ks[4], (hidden_size, hidden_size + input_size), jnp.float32),
            "b_c": jax.random.normal(ks[5], (hidden_size,), jnp.float32),
            "W_o": jax.random.normal(ks[6], (hidden_size, hidden_size + input_size), jnp.float32),
            "b_o": jax.random.normal(ks[7], (hidden_size,), jnp.float32),
        }
        params.append(p)
    return params


def _run_check(batch, seq_len, input_size, hidden_size, layers, seed=0):
    key = jax.random.PRNGKey(seed)
    k_x, k_p = jax.random.split(key)
    x = jax.random.normal(k_x, (batch, seq_len, input_size), jnp.float32)
    params = make_params(k_p, input_size, hidden_size, layers)

    out, (h_T, c_T) = lstm_forward(x, params)
    jax.block_until_ready((out, h_T, c_T))

    out_ref, (h_ref, c_ref) = lstm_forward_ref(x, params)
    assert out.shape == (batch, seq_len, hidden_size)
    assert h_T.shape == (layers, batch, hidden_size)
    assert c_T.shape == (layers, batch, hidden_size)
    assert jnp.allclose(out, out_ref, atol=2e-4, rtol=2e-4), \
        f"out max err {float(jnp.max(jnp.abs(out - out_ref)))}"
    assert jnp.allclose(h_T, h_ref, atol=2e-4, rtol=2e-4)
    assert jnp.allclose(c_T, c_ref, atol=2e-4, rtol=2e-4)


if __name__ == "__main__":
    # Single layer, input_size != hidden_size (module default configuration).
    _run_check(batch=4, seq_len=8, input_size=16, hidden_size=32, layers=1, seed=0)
    # Stacked layers (the reference module requires input_size == hidden_size
    # for layers > 1, since all weight matrices are (H, H + input_size)).
    _run_check(batch=4, seq_len=8, input_size=32, hidden_size=32, layers=2, seed=0)
    print("KERNEL_OK")
</pallas_src>

<mosaic_0001>
module attributes {stable_mosaic.version = 11 : i64} {
  func.func @_lstm_stack_kernel(%arg0: i32, %arg1: memref<8x8x16xf32, #tpu.memory_space<vmem>>, %arg2: memref<1x16x128xf32, #tpu.memory_space<vmem>>, %arg3: memref<1x32x128xf32, #tpu.memory_space<vmem>>, %arg4: memref<1x1x128xf32, #tpu.memory_space<vmem>>, %arg5: memref<8x8x32xf32, #tpu.memory_space<vmem>>, %arg6: memref<1x8x32xf32, #tpu.memory_space<vmem>>, %arg7: memref<1x8x32xf32, #tpu.memory_space<vmem>>, %arg8: memref<1x8x32xf32, #tpu.memory_space<vmem>>, %arg9: memref<1x8x32xf32, #tpu.memory_space<vmem>>, %arg10: memref<8x8x32xf32, #tpu.memory_space<vmem>>, %arg11: memref<8x8x128xf32, #tpu.memory_space<vmem>>) attributes {dimension_semantics = [#tpu.dimension_semantics<arbitrary>], iteration_bounds = array<i64: 1>, scalar_prefetch = 0 : i64, scratch_operands = 4 : i64, tpu.core_type = #tpu.core_type<tc>, window_params = [{transform_indices = @transform_0, window_bounds = array<i64: 8, 8, 16>}, {pipeline_mode = #tpu.pipeline_mode<synchronous>, transform_indices = @transform_1, window_bounds = array<i64: 1, 16, 128>}, {pipeline_mode = #tpu.pipeline_mode<synchronous>, transform_indices = @transform_2, window_bounds = array<i64: 1, 32, 128>}, {pipeline_mode = #tpu.pipeline_mode<synchronous>, transform_indices = @transform_3, window_bounds = array<i64: 1, 1, 128>}, {transform_indices = @transform_4, window_bounds = array<i64: 8, 8, 32>}, {pipeline_mode = #tpu.pipeline_mode<synchronous>, transform_indices = @transform_5, window_bounds = array<i64: 1, 8, 32>}, {pipeline_mode = #tpu.pipeline_mode<synchronous>, transform_indices = @transform_6, window_bounds = array<i64: 1, 8, 32>}]} {
    %c0_i32 = arith.constant 0 : i32
    %0 = arith.cmpi eq, %arg0, %c0_i32 : i32
    %1 = arith.extui %0 : i1 to i32
    %c0_i32_0 = arith.constant 0 : i32
    %2 = arith.cmpi ne, %1, %c0_i32_0 : i32
    scf.if %2 {
      %cst_118 = arith.constant 0.000000e+00 : f32
      %277 = vector.broadcast %cst_118 : f32 to vector<1x8x32xf32>
      %c0_119 = arith.constant 0 : index
      %c0_120 = arith.constant 0 : index
      %c0_121 = arith.constant 0 : index
      %278 = vector.load %arg8[%c0_119, %c0_120, %c0_121] : memref<1x8x32xf32, #tpu.memory_space<vmem>>, vector<1x8x32xf32>
      tpu.vector_store %arg8[%c0_119, %c0_120, %c0_121], %277 {strides = array<i32>} : memref<1x8x32xf32, #tpu.memory_space<vmem>>, vector<1x8x32xf32>,
      %cst_122 = arith.constant 0.000000e+00 : f32
      %279 = vector.broadcast %cst_122 : f32 to vector<1x8x32xf32>
      %c0_123 = arith.constant 0 : index
      %c0_124 = arith.constant 0 : index
      %c0_125 = arith.constant 0 : index
      %280 = vector.load %arg9[%c0_123, %c0_124, %c0_125] : memref<1x8x32xf32, #tpu.memory_space<vmem>>, vector<1x8x32xf32>
      tpu.vector_store %arg9[%c0_123, %c0_124, %c0_125], %279 {strides = array<i32>} : memref<1x8x32xf32, #tpu.memory_space<vmem>>, vector<1x8x32xf32>,
    } else {
    }
    %c0 = arith.constant 0 : index
    %c0_1 = arith.constant 0 : index
    %c0_2 = arith.constant 0 : index
    %3 = vector.load %arg2[%c0, %c0_1, %c0_2] : memref<1x16x128xf32, #tpu.memory_space<vmem>>, vector<1x16x128xf32>
    %4 = vector.shape_cast %3 : vector<1x16x128xf32> to vector<16x128xf32>
    %c0_3 = arith.constant 0 : index
    %c0_4 = arith.constant 0 : index
    %c0_5 = arith.constant 0 : index
    %5 = vector.load %arg3[%c0_3, %c0_4, %c0_5] : memref<1x32x128xf32, #tpu.memory_space<vmem>>, vector<1x32x128xf32>
    %6 = vector.shape_cast %5 : vector<1x32x128xf32> to vector<32x128xf32>
    %c0_6 = arith.constant 0 : index
    %c0_7 = arith.constant 0 : index
    %c0_8 = arith.constant 0 : index
    %7 = vector.load %arg4[%c0_6, %c0_7, %c0_8] : memref<1x1x128xf32, #tpu.memory_space<vmem>>, vector<1x1x128xf32>
    %8 = vector.shape_cast %7 : vector<1x1x128xf32> to vector<1x128xf32>
    %c0_9 = arith.constant 0 : index
    %c0_10 = arith.constant 0 : index
    %c0_11 = arith.constant 0 : index
    %9 = vector.load %arg1[%c0_9, %c0_10, %c0_11] : memref<8x8x16xf32, #tpu.memory_space<vmem>>, vector<8x8x16xf32>
    %10 = vector.shape_cast %9 : vector<8x8x16xf32> to vector<64x16xf32>
    %cst = arith.constant dense<0.000000e+00> : vector<64x128xf32>
    %11 = tpu.matmul %10, %4, %cst {dimension_numbers = #tpu.dot_dimension_numbers<[1], [0], [0], [1], [0, 0, 1, 1], [], []>} : vector<64x16xf32>, vector<16x128xf32>, vector<64x128xf32> -> vector<64x128xf32>
    %12 = vector.broadcast %8 : vector<1x128xf32> to vector<64x128xf32>
    %13 = arith.addf %11, %12 : vector<64x128xf32>
    %14 = vector.shape_cast %13 : vector<64x128xf32> to vector<8x8x128xf32>
    %c0_12 = arith.constant 0 : index
    %c0_13 = arith.constant 0 : index
    %c0_14 = arith.constant 0 : index
    %15 = vector.load %arg11[%c0_12, %c0_13, %c0_14] : memref<8x8x128xf32, #tpu.memory_space<vmem>>, vector<8x8x128xf32>
    tpu.vector_store %arg11[%c0_12, %c0_13, %c0_14], %14 {strides = array<i32>} : memref<8x8x128xf32, #tpu.memory_space<vmem>>, vector<8x8x128xf32>,
    %c0_15 = arith.constant 0 : index
    %c0_16 = arith.constant 0 : index
    %c0_17 = arith.constant 0 : index
    %16 = vector.load %arg8[%c0_15, %c0_16, %c0_17] : memref<1x8x32xf32, #tpu.memory_space<vmem>>, vector<1x8x32xf32>
    %17 = vector.shape_cast %16 : vector<1x8x32xf32> to vector<8x32xf32>
    %c0_18 = arith.constant 0 : index
    %c0_19 = arith.constant 0 : index
    %c0_20 = arith.constant 0 : index
    %18 = vector.load %arg9[%c0_18, %c0_19, %c0_20] : memref<1x8x32xf32, #tpu.memory_space<vmem>>, vector<1x8x32xf32>
    %19 = vector.shape_cast %18 : vector<1x8x32xf32> to vector<8x32xf32>
    %c0_i32_21 = arith.constant 0 : i32
    %20 = arith.index_cast %c0_i32_21 : i32 to index
    %c0_22 = arith.constant 0 : index
    %c0_23 = arith.constant 0 : index
    %21 = vector.load %arg11[%20, %c0_22, %c0_23] : memref<8x8x128xf32, #tpu.memory_space<vmem>>, vector<1x8x128xf32>
    %22 = vector.shape_cast %21 : vector<1x8x128xf32> to vector<8x128xf32>
    %cst_24 = arith.constant dense<0.000000e+00> : vector<8x128xf32>
    %23 = tpu.matmul %17, %6, %cst_24 {dimension_numbers = #tpu.dot_dimension_numbers<[1], [0], [0], [1], [0, 0, 1, 1], [], []>} : vector<8x32xf32>, vector<32x128xf32>, vector<8x128xf32> -> vector<8x128xf32>
    %24 = arith.addf %22, %23 : vector<8x128xf32>
    %25 = math.tanh %24 : vector<8x128xf32>
    %26 = vector.extract_strided_slice %25 {offsets = [0, 0], sizes = [8, 32], strides = [1, 1]} : vector<8x128xf32> to vector<8x32xf32>
    %cst_25 = arith.constant 5.000000e-01 : f32
    %27 = vector.broadcast %cst_25 : f32 to vector<8x32xf32>
    %28 = arith.mulf %27, %26 : vector<8x32xf32>
    %cst_26 = arith.constant 5.000000e-01 : f32
    %29 = vector.broadcast %cst_26 : f32 to vector<8x32xf32>
    %30 = arith.addf %28, %29 : vector<8x32xf32>
    %31 = vector.extract_strided_slice %25 {offsets = [0, 32], sizes = [8, 32], strides = [1, 1]} : vector<8x128xf32> to vector<8x32xf32>
    %cst_27 = arith.constant 5.000000e-01 : f32
    %32 = vector.broadcast %cst_27 : f32 to vector<8x32xf32>
    %33 = arith.mulf %32, %31 : vector<8x32xf32>
    %cst_28 = arith.constant 5.000000e-01 : f32
    %34 = vector.broadcast %cst_28 : f32 to vector<8x32xf32>
    %35 = arith.addf %33, %34 : vector<8x32xf32>
    %36 = vector.extract_strided_slice %25 {offsets = [0, 64], sizes = [8, 32], strides = [1, 1]} : vector<8x128xf32> to vector<8x32xf32>
    %37 = vector.extract_strided_slice %25 {offsets = [0, 96], sizes = [8, 32], strides = [1, 1]} : vector<8x128xf32> to vector<8x32xf32>
    %cst_29 = arith.constant 5.000000e-01 : f32
    %38 = vector.broadcast %cst_29 : f32 to vector<8x32xf32>
    %39 = arith.mulf %38, %37 : vector<8x32xf32>
    %cst_30 = arith.constant 5.000000e-01 : f32
    %40 = vector.broadcast %cst_30 : f32 to vector<8x32xf32>
    %41 = arith.addf %39, %40 : vector<8x32xf32>
    %42 = arith.mulf %30, %19 : vector<8x32xf32>
    %43 = arith.mulf %35, %36 : vector<8x32xf32>
    %44 = arith.addf %42, %43 : vector<8x32xf32>
    %45 = math.tanh %44 : vector<8x32xf32>
    %46 = arith.mulf %41, %45 : vector<8x32xf32>
    %47 = arith.index_cast %c0_i32_21 : i32 to index
    %c0_31 = arith.constant 0 : index
    %c0_32 = arith.constant 0 : index
    %48 = vector.load %arg5[%47, %c0_31, %c0_32] : memref<8x8x32xf32, #tpu.memory_space<vmem>>, vector<1x8x32xf32>
    %49 = vector.shape_cast %48 : vector<1x8x32xf32> to vector<8x32xf32>
    %50 = vector.shape_cast %46 : vector<8x32xf32> to vector<1x8x32xf32>
    tpu.vector_store %arg5[%47, %c0_31, %c0_32], %50 {strides = array<i32>} : memref<8x8x32xf32, #tpu.memory_space<vmem>>, vector<1x8x32xf32>,
    %c1_i32 = arith.constant 1 : i32
    %51 = arith.index_cast %c1_i32 : i32 to index
    %c0_33 = arith.constant 0 : index
    %c0_34 = arith.constant 0 : index
    %52 = vector.load %arg11[%51, %c0_33, %c0_34] : memref<8x8x128xf32, #tpu.memory_space<vmem>>, vector<1x8x128xf32>
    %53 = vector.shape_cast %52 : vector<1x8x128xf32> to vector<8x128xf32>
    %cst_35 = arith.constant dense<0.000000e+00> : vector<8x128xf32>
    %54 = tpu.matmul %46, %6, %cst_35 {dimension_numbers = #tpu.dot_dimension_numbers<[1], [0], [0], [1], [0, 0, 1, 1], [], []>} : vector<8x32xf32>, vector<32x128xf32>, vector<8x128xf32> -> vector<8x128xf32>
    %55 = arith.addf %53, %54 : vector<8x128xf32>
    %56 = math.tanh %55 : vector<8x128xf32>
    %57 = vector.extract_strided_slice %56 {offsets = [0, 0], sizes = [8, 32], strides = [1, 1]} : vector<8x128xf32> to vector<8x32xf32>
    %cst_36 = arith.constant 5.000000e-01 : f32
    %58 = vector.broadcast %cst_36 : f32 to vector<8x32xf32>
    %59 = arith.mulf %58, %57 : vector<8x32xf32>
    %cst_37 = arith.constant 5.000000e-01 : f32
    %60 = vector.broadcast %cst_37 : f32 to vector<8x32xf32>
    %61 = arith.addf %59, %60 : vector<8x32xf32>
    %62 = vector.extract_strided_slice %56 {offsets = [0, 32], sizes = [8, 32], strides = [1, 1]} : vector<8x128xf32> to vector<8x32xf32>
    %cst_38 = arith.constant 5.000000e-01 : f32
    %63 = vector.broadcast %cst_38 : f32 to vector<8x32xf32>
    %64 = arith.mulf %63, %62 : vector<8x32xf32>
    %cst_39 = arith.constant 5.000000e-01 : f32
    %65 = vector.broadcast %cst_39 : f32 to vector<8x32xf32>
    %66 = arith.addf %64, %65 : vector<8x32xf32>
    %67 = vector.extract_strided_slice %56 {offsets = [0, 64], sizes = [8, 32], strides = [1, 1]} : vector<8x128xf32> to vector<8x32xf32>
    %68 = vector.extract_strided_slice %56 {offsets = [0, 96], sizes = [8, 32], strides = [1, 1]} : vector<8x128xf32> to vector<8x32xf32>
    %cst_40 = arith.constant 5.000000e-01 : f32
    %69 = vector.broadcast %cst_40 : f32 to vector<8x32xf32>
    %70 = arith.mulf %69, %68 : vector<8x32xf32>
    %cst_41 = arith.constant 5.000000e-01 : f32
    %71 = vector.broadcast %cst_41 : f32 to vector<8x32xf32>
    %72 = arith.addf %70, %71 : vector<8x32xf32>
    %73 = arith.mulf %61, %44 : vector<8x32xf32>
    %74 = arith.mulf %66, %67 : vector<8x32xf32>
    %75 = arith.addf %73, %74 : vector<8x32xf32>
    %76 = math.tanh %75 : vector<8x32xf32>
    %77 = arith.mulf %72, %76 : vector<8x32xf32>
    %78 = arith.index_cast %c1_i32 : i32 to index
    %c0_42 = arith.constant 0 : index
    %c0_43 = arith.constant 0 : index
    %79 = vector.load %arg5[%78, %c0_42, %c0_43] : memref<8x8x32xf32, #tpu.memory_space<vmem>>, vector<1x8x32xf32>
    %80 = vector.shape_cast %79 : vector<1x8x32xf32> to vector<8x32xf32>
    %81 = vector.shape_cast %77 : vector<8x32xf32> to vector<1x8x32xf32>
    tpu.vector_store %arg5[%78, %c0_42, %c0_43], %81 {strides = array<i32>} : memref<8x8x32xf32, #tpu.memory_space<vmem>>, vector<1x8x32xf32>,
    %c2_i32 = arith.constant 2 : i32
    %82 = arith.index_cast %c2_i32 : i32 to index
    %c0_44 = arith.constant 0 : index
    %c0_45 = arith.constant 0 : index
    %83 = vector.load %arg11[%82, %c0_44, %c0_45] : memref<8x8x128xf32, #tpu.memory_space<vmem>>, vector<1x8x128xf32>
    %84 = vector.shape_cast %83 : vector<1x8x128xf32> to vector<8x128xf32>
    %cst_46 = arith.constant dense<0.000000e+00> : vector<8x128xf32>
    %85 = tpu.matmul %77, %6, %cst_46 {dimension_numbers = #tpu.dot_dimension_numbers<[1], [0], [0], [1], [0, 0, 1, 1], [], []>} : vector<8x32xf32>, vector<32x128xf32>, vector<8x128xf32> -> vector<8x128xf32>
    %86 = arith.addf %84, %85 : vector<8x128xf32>
    %87 = math.tanh %86 : vector<8x128xf32>
    %88 = vector.extract_strided_slice %87 {offsets = [0, 0], sizes = [8, 32], strides = [1, 1]} : vector<8x128xf32> to vector<8x32xf32>
    %cst_47 = arith.constant 5.000000e-01 : f32
    %89 = vector.broadcast %cst_47 : f32 to vector<8x32xf32>
    %90 = arith.mulf %89, %88 : vector<8x32xf32>
    %cst_48 = arith.constant 5.000000e-01 : f32
    %91 = vector.broadcast %cst_48 : f32 to vector<8x32xf32>
    %92 = arith.addf %90, %91 : vector<8x32xf32>
    %93 = vector.extract_strided_slice %87 {offsets = [0, 32], sizes = [8, 32], strides = [1, 1]} : vector<8x128xf32> to vector<8x32xf32>
    %cst_49 = arith.constant 5.000000e-01 : f32
    %94 = vector.broadcast %cst_49 : f32 to vector<8x32xf32>
    %95 = arith.mulf %94, %93 : vector<8x32xf32>
    %cst_50 = arith.constant 5.000000e-01 : f32
    %96 = vector.broadcast %cst_50 : f32 to vector<8x32xf32>
    %97 = arith.addf %95, %96 : vector<8x32xf32>
    %98 = vector.extract_strided_slice %87 {offsets = [0, 64], sizes = [8, 32], strides = [1, 1]} : vector<8x128xf32> to vector<8x32xf32>
    %99 = vector.extract_strided_slice %87 {offsets = [0, 96], sizes = [8, 32], strides = [1, 1]} : vector<8x128xf32> to vector<8x32xf32>
    %cst_51 = arith.constant 5.000000e-01 : f32
    %100 = vector.broadcast %cst_51 : f32 to vector<8x32xf32>
    %101 = arith.mulf %100, %99 : vector<8x32xf32>
    %cst_52 = arith.constant 5.000000e-01 : f32
    %102 = vector.broadcast %cst_52 : f32 to vector<8x32xf32>
    %103 = arith.addf %101, %102 : vector<8x32xf32>
    %104 = arith.mulf %92, %75 : vector<8x32xf32>
    %105 = arith.mulf %97, %98 : vector<8x32xf32>
    %106 = arith.addf %104, %105 : vector<8x32xf32>
    %107 = math.tanh %106 : vector<8x32xf32>
    %108 = arith.mulf %103, %107 : vector<8x32xf32>
    %109 = arith.index_cast %c2_i32 : i32 to index
    %c0_53 = arith.constant 0 : index
    %c0_54 = arith.constant 0 : index
    %110 = vector.load %arg5[%109, %c0_53, %c0_54] : memref<8x8x32xf32, #tpu.memory_space<vmem>>, vector<1x8x32xf32>
    %111 = vector.shape_cast %110 : vector<1x8x32xf32> to vector<8x32xf32>
    %112 = vector.shape_cast %108 : vector<8x32xf32> to vector<1x8x32xf32>
    tpu.vector_store %arg5[%109, %c0_53, %c0_54], %112 {strides = array<i32>} : memref<8x8x32xf32, #tpu.memory_space<vmem>>, vector<1x8x32xf32>,
    %c3_i32 = arith.constant 3 : i32
    %113 = arith.index_cast %c3_i32 : i32 to index
    %c0_55 = arith.constant 0 : index
    %c0_56 = arith.constant 0 : index
    %114 = vector.load %arg11[%113, %c0_55, %c0_56] : memref<8x8x128xf32, #tpu.memory_space<vmem>>, vector<1x8x128xf32>
    %115 = vector.shape_cast %114 : vector<1x8x128xf32> to vector<8x128xf32>
    %cst_57 = arith.constant dense<0.000000e+00> : vector<8x128xf32>
    %116 = tpu.matmul %108, %6, %cst_57 {dimension_numbers = #tpu.dot_dimension_numbers<[1], [0], [0], [1], [0, 0, 1, 1], [], []>} : vector<8x32xf32>, vector<32x128xf32>, vector<8x128xf32> -> vector<8x128xf32>
    %117 = arith.addf %115, %116 : vector<8x128xf32>
    %118 = math.tanh %117 : vector<8x128xf32>
    %119 = vector.extract_strided_slice %118 {offsets = [0, 0], sizes = [8, 32], strides = [1, 1]} : vector<8x128xf32> to vector<8x32xf32>
    %cst_58 = arith.constant 5.000000e-01 : f32
    %120 = vector.broadcast %cst_58 : f32 to vector<8x32xf32>
    %121 = arith.mulf %120, %119 : vector<8x32xf32>
    %cst_59 = arith.constant 5.000000e-01 : f32
    %122 = vector.broadcast %cst_59 : f32 to vector<8x32xf32>
    %123 = arith.addf %121, %122 : vector<8x32xf32>
    %124 = vector.extract_strided_slice %118 {offsets = [0, 32], sizes = [8, 32], strides = [1, 1]} : vector<8x128xf32> to vector<8x32xf32>
    %cst_60 = arith.constant 5.000000e-01 : f32
    %125 = vector.broadcast %cst_60 : f32 to vector<8x32xf32>
    %126 = arith.mulf %125, %124 : vector<8x32xf32>
    %cst_61 = arith.constant 5.000000e-01 : f32
    %127 = vector.broadcast %cst_61 : f32 to vector<8x32xf32>
    %128 = arith.addf %126, %127 : vector<8x32xf32>
    %129 = vector.extract_strided_slice %118 {offsets = [0, 64], sizes = [8, 32], strides = [1, 1]} : vector<8x128xf32> to vector<8x32xf32>
    %130 = vector.extract_strided_slice %118 {offsets = [0, 96], sizes = [8, 32], strides = [1, 1]} : vector<8x128xf32> to vector<8x32xf32>
    %cst_62 = arith.constant 5.000000e-01 : f32
    %131 = vector.broadcast %cst_62 : f32 to vector<8x32xf32>
    %132 = arith.mulf %131, %130 : vector<8x32xf32>
    %cst_63 = arith.constant 5.000000e-01 : f32
    %133 = vector.broadcast %cst_63 : f32 to vector<8x32xf32>
    %134 = arith.addf %132, %133 : vector<8x32xf32>
    %135 = arith.mulf %123, %106 : vector<8x32xf32>
    %136 = arith.mulf %128, %129 : vector<8x32xf32>
    %137 = arith.addf %135, %136 : vector<8x32xf32>
    %138 = math.tanh %137 : vector<8x32xf32>
    %139 = arith.mulf %134, %138 : vector<8x32xf32>
    %140 = arith.index_cast %c3_i32 : i32 to index
    %c0_64 = arith.constant 0 : index
    %c0_65 = arith.constant 0 : index
    %141 = vector.load %arg5[%140, %c0_64, %c0_65] : memref<8x8x32xf32, #tpu.memory_space<vmem>>, vector<1x8x32xf32>
    %142 = vector.shape_cast %141 : vector<1x8x32xf32> to vector<8x32xf32>
    %143 = vector.shape_cast %139 : vector<8x32xf32> to vector<1x8x32xf32>
    tpu.vector_store %arg5[%140, %c0_64, %c0_65], %143 {strides = array<i32>} : memref<8x8x32xf32, #tpu.memory_space<vmem>>, vector<1x8x32xf32>,
    %c4_i32 = arith.constant 4 : i32
    %144 = arith.index_cast %c4_i32 : i32 to index
    %c0_66 = arith.constant 0 : index
    %c0_67 = arith.constant 0 : index
    %145 = vector.load %arg11[%144, %c0_66, %c0_67] : memref<8x8x128xf32, #tpu.memory_space<vmem>>, vector<1x8x128xf32>
    %146 = vector.shape_cast %145 : vector<1x8x128xf32> to vector<8x128xf32>
    %cst_68 = arith.constant dense<0.000000e+00> : vector<8x128xf32>
    %147 = tpu.matmul %139, %6, %cst_68 {dimension_numbers = #tpu.dot_dimension_numbers<[1], [0], [0], [1], [0, 0, 1, 1], [], []>} : vector<8x32xf32>, vector<32x128xf32>, vector<8x128xf32> -> vector<8x128xf32>
    %148 = arith.addf %146, %147 : vector<8x128xf32>
    %149 = math.tanh %148 : vector<8x128xf32>
    %150 = vector.extract_strided_slice %149 {offsets = [0, 0], sizes = [8, 32], strides = [1, 1]} : vector<8x128xf32> to vector<8x32xf32>
    %cst_69 = arith.constant 5.000000e-01 : f32
    %151 = vector.broadcast %cst_69 : f32 to vector<8x32xf32>
    %152 = arith.mulf %151, %150 : vector<8x32xf32>
    %cst_70 = arith.constant 5.000000e-01 : f32
    %153 = vector.broadcast %cst_70 : f32 to vector<8x32xf32>
    %154 = arith.addf %152, %153 : vector<8x32xf32>
    %155 = vector.extract_strided_slice %149 {offsets = [0, 32], sizes = [8, 32], strides = [1, 1]} : vector<8x128xf32> to vector<8x32xf32>
    %cst_71 = arith.constant 5.000000e-01 : f32
    %156 = vector.broadcast %cst_71 : f32 to vector<8x32xf32>
    %157 = arith.mulf %156, %155 : vector<8x32xf32>
    %cst_72 = arith.constant 5.000000e-01 : f32
    %158 = vector.broadcast %cst_72 : f32 to vector<8x32xf32>
    %159 = arith.addf %157, %158 : vector<8x32xf32>
    %160 = vector.extract_strided_slice %149 {offsets = [0, 64], sizes = [8, 32], strides = [1, 1]} : vector<8x128xf32> to vector<8x32xf32>
    %161 = vector.extract_strided_slice %149 {offsets = [0, 96], sizes = [8, 32], strides = [1, 1]} : vector<8x128xf32> to vector<8x32xf32>
    %cst_73 = arith.constant 5.000000e-01 : f32
    %162 = vector.broadcast %cst_73 : f32 to vector<8x32xf32>
    %163 = arith.mulf %162, %161 : vector<8x32xf32>
    %cst_74 = arith.constant 5.000000e-01 : f32
    %164 = vector.broadcast %cst_74 : f32 to vector<8x32xf32>
    %165 = arith.addf %163, %164 : vector<8x32xf32>
    %166 = arith.mulf %154, %137 : vector<8x32xf32>
    %167 = arith.mulf %159, %160 : vector<8x32xf32>
    %168 = arith.addf %166, %167 : vector<8x32xf32>
    %169 = math.tanh %168 : vector<8x32xf32>
    %170 = arith.mulf %165, %169 : vector<8x32xf32>
    %171 = arith.index_cast %c4_i32 : i32 to index
    %c0_75 = arith.constant 0 : index
    %c0_76 = arith.constant 0 : index
    %172 = vector.load %arg5[%171, %c0_75, %c0_76] : memref<8x8x32xf32, #tpu.memory_space<vmem>>, vector<1x8x32xf32>
    %173 = vector.shape_cast %172 : vector<1x8x32xf32> to vector<8x32xf32>
    %174 = vector.shape_cast %170 : vector<8x32xf32> to vector<1x8x32xf32>
    tpu.vector_store %arg5[%171, %c0_75, %c0_76], %174 {strides = array<i32>} : memref<8x8x32xf32, #tpu.memory_space<vmem>>, vector<1x8x32xf32>,
    %c5_i32 = arith.constant 5 : i32
    %175 = arith.index_cast %c5_i32 : i32 to index
    %c0_77 = arith.constant 0 : index
    %c0_78 = arith.constant 0 : index
    %176 = vector.load %arg11[%175, %c0_77, %c0_78] : memref<8x8x128xf32, #tpu.memory_space<vmem>>, vector<1x8x128xf32>
    %177 = vector.shape_cast %176 : vector<1x8x128xf32> to vector<8x128xf32>
    %cst_79 = arith.constant dense<0.000000e+00> : vector<8x128xf32>
    %178 = tpu.matmul %170, %6, %cst_79 {dimension_numbers = #tpu.dot_dimension_numbers<[1], [0], [0], [1], [0, 0, 1, 1], [], []>} : vector<8x32xf32>, vector<32x128xf32>, vector<8x128xf32> -> vector<8x128xf32>
    %179 = arith.addf %177, %178 : vector<8x128xf32>
    %180 = math.tanh %179 : vector<8x128xf32>
    %181 = vector.extract_strided_slice %180 {offsets = [0, 0], sizes = [8, 32], strides = [1, 1]} : vector<8x128xf32> to vector<8x32xf32>
    %cst_80 = arith.constant 5.000000e-01 : f32
    %182 = vector.broadcast %cst_80 : f32 to vector<8x32xf32>
    %183 = arith.mulf %182, %181 : vector<8x32xf32>
    %cst_81 = arith.constant 5.000000e-01 : f32
    %184 = vector.broadcast %cst_81 : f32 to vector<8x32xf32>
    %185 = arith.addf %183, %184 : vector<8x32xf32>
    %186 = vector.extract_strided_slice %180 {offsets = [0, 32], sizes = [8, 32], strides = [1, 1]} : vector<8x128xf32> to vector<8x32xf32>
    %cst_82 = arith.constant 5.000000e-01 : f32
    %187 = vector.broadcast %cst_82 : f32 to vector<8x32xf32>
    %188 = arith.mulf %187, %186 : vector<8x32xf32>
    %cst_83 = arith.constant 5.000000e-01 : f32
    %189 = vector.broadcast %cst_83 : f32 to vector<8x32xf32>
    %190 = arith.addf %188, %189 : vector<8x32xf32>
    %191 = vector.extract_strided_slice %180 {offsets = [0, 64], sizes = [8, 32], strides = [1, 1]} : vector<8x128xf32> to vector<8x32xf32>
    %192 = vector.extract_strided_slice %180 {offsets = [0, 96], sizes = [8, 32], strides = [1, 1]} : vector<8x128xf32> to vector<8x32xf32>
    %cst_84 = arith.constant 5.000000e-01 : f32
    %193 = vector.broadcast %cst_84 : f32 to vector<8x32xf32>
    %194 = arith.mulf %193, %192 : vector<8x32xf32>
    %cst_85 = arith.constant 5.000000e-01 : f32
    %195 = vector.broadcast %cst_85 : f32 to vector<8x32xf32>
    %196 = arith.addf %194, %195 : vector<8x32xf32>
    %197 = arith.mulf %185, %168 : vector<8x32xf32>
    %198 = arith.mulf %190, %191 : vector<8x32xf32>
    %199 = arith.addf %197, %198 : vector<8x32xf32>
    %200 = math.tanh %199 : vector<8x32xf32>
    %201 = arith.mulf %196, %200 : vector<8x32xf32>
    %202 = arith.index_cast %c5_i32 : i32 to index
    %c0_86 = arith.constant 0 : index
    %c0_87 = arith.constant 0 : index
    %203 = vector.load %arg5[%202, %c0_86, %c0_87] : memref<8x8x32xf32, #tpu.memory_space<vmem>>, vector<1x8x32xf32>
    %204 = vector.shape_cast %203 : vector<1x8x32xf32> to vector<8x32xf32>
    %205 = vector.shape_cast %201 : vector<8x32xf32> to vector<1x8x32xf32>
    tpu.vector_store %arg5[%202, %c0_86, %c0_87], %205 {strides = array<i32>} : memref<8x8x32xf32, #tpu.memory_space<vmem>>, vector<1x8x32xf32>,
    %c6_i32 = arith.constant 6 : i32
    %206 = arith.index_cast %c6_i32 : i32 to index
    %c0_88 = arith.constant 0 : index
    %c0_89 = arith.constant 0 : index
    %207 = vector.load %arg11[%206, %c0_88, %c0_89] : memref<8x8x128xf32, #tpu.memory_space<vmem>>, vector<1x8x128xf32>
    %208 = vector.shape_cast %207 : vector<1x8x128xf32> to vector<8x128xf32>
    %cst_90 = arith.constant dense<0.000000e+00> : vector<8x128xf32>
    %209 = tpu.matmul %201, %6, %cst_90 {dimension_numbers = #tpu.dot_dimension_numbers<[1], [0], [0], [1], [0, 0, 1, 1], [], []>} : vector<8x32xf32>, vector<32x128xf32>, vector<8x128xf32> -> vector<8x128xf32>
    %210 = arith.addf %208, %209 : vector<8x128xf32>
    %211 = math.tanh %210 : vector<8x128xf32>
    %212 = vector.extract_strided_slice %211 {offsets = [0, 0], sizes = [8, 32], strides = [1, 1]} : vector<8x128xf32> to vector<8x32xf32>
    %cst_91 = arith.constant 5.000000e-01 : f32
    %213 = vector.broadcast %cst_91 : f32 to vector<8x32xf32>
    %214 = arith.mulf %213, %212 : vector<8x32xf32>
    %cst_92 = arith.constant 5.000000e-01 : f32
    %215 = vector.broadcast %cst_92 : f32 to vector<8x32xf32>
    %216 = arith.addf %214, %215 : vector<8x32xf32>
    %217 = vector.extract_strided_slice %211 {offsets = [0, 32], sizes = [8, 32], strides = [1, 1]} : vector<8x128xf32> to vector<8x32xf32>
    %cst_93 = arith.constant 5.000000e-01 : f32
    %218 = vector.broadcast %cst_93 : f32 to vector<8x32xf32>
    %219 = arith.mulf %218, %217 : vector<8x32xf32>
    %cst_94 = arith.constant 5.000000e-01 : f32
    %220 = vector.broadcast %cst_94 : f32 to vector<8x32xf32>
    %221 = arith.addf %219, %220 : vector<8x32xf32>
    %222 = vector.extract_strided_slice %211 {offsets = [0, 64], sizes = [8, 32], strides = [1, 1]} : vector<8x128xf32> to vector<8x32xf32>
    %223 = vector.extract_strided_slice %211 {offsets = [0, 96], sizes = [8, 32], strides = [1, 1]} : vector<8x128xf32> to vector<8x32xf32>
    %cst_95 = arith.constant 5.000000e-01 : f32
    %224 = vector.broadcast %cst_95 : f32 to vector<8x32xf32>
    %225 = arith.mulf %224, %223 : vector<8x32xf32>
    %cst_96 = arith.constant 5.000000e-01 : f32
    %226 = vector.broadcast %cst_96 : f32 to vector<8x32xf32>
    %227 = arith.addf %225, %226 : vector<8x32xf32>
    %228 = arith.mulf %216, %199 : vector<8x32xf32>
    %229 = arith.mulf %221, %222 : vector<8x32xf32>
    %230 = arith.addf %228, %229 : vector<8x32xf32>
    %231 = math.tanh %230 : vector<8x32xf32>
    %232 = arith.mulf %227, %231 : vector<8x32xf32>
    %233 = arith.index_cast %c6_i32 : i32 to index
    %c0_97 = arith.constant 0 : index
    %c0_98 = arith.constant 0 : index
    %234 = vector.load %arg5[%233, %c0_97, %c0_98] : memref<8x8x32xf32, #tpu.memory_space<vmem>>, vector<1x8x32xf32>
    %235 = vector.shape_cast %234 : vector<1x8x32xf32> to vector<8x32xf32>
    %236 = vector.shape_cast %232 : vector<8x32xf32> to vector<1x8x32xf32>
    tpu.vector_store %arg5[%233, %c0_97, %c0_98], %236 {strides = array<i32>} : memref<8x8x32xf32, #tpu.memory_space<vmem>>, vector<1x8x32xf32>,
    %c7_i32 = arith.constant 7 : i32
    %237 = arith.index_cast %c7_i32 : i32 to index
    %c0_99 = arith.constant 0 : index
    %c0_100 = arith.constant 0 : index
    %238 = vector.load %arg11[%237, %c0_99, %c0_100] : memref<8x8x128xf32, #tpu.memory_space<vmem>>, vector<1x8x128xf32>
    %239 = vector.shape_cast %238 : vector<1x8x128xf32> to vector<8x128xf32>
    %cst_101 = arith.constant dense<0.000000e+00> : vector<8x128xf32>
    %240 = tpu.matmul %232, %6, %cst_101 {dimension_numbers = #tpu.dot_dimension_numbers<[1], [0], [0], [1], [0, 0, 1, 1], [], []>} : vector<8x32xf32>, vector<32x128xf32>, vector<8x128xf32> -> vector<8x128xf32>
    %241 = arith.addf %239, %240 : vector<8x128xf32>
    %242 = math.tanh %241 : vector<8x128xf32>
    %243 = vector.extract_strided_slice %242 {offsets = [0, 0], sizes = [8, 32], strides = [1, 1]} : vector<8x128xf32> to vector<8x32xf32>
    %cst_102 = arith.constant 5.000000e-01 : f32
    %244 = vector.broadcast %cst_102 : f32 to vector<8x32xf32>
    %245 = arith.mulf %244, %243 : vector<8x32xf32>
    %cst_103 = arith.constant 5.000000e-01 : f32
    %246 = vector.broadcast %cst_103 : f32 to vector<8x32xf32>
    %247 = arith.addf %245, %246 : vector<8x32xf32>
    %248 = vector.extract_strided_slice %242 {offsets = [0, 32], sizes = [8, 32], strides = [1, 1]} : vector<8x128xf32> to vector<8x32xf32>
    %cst_104 = arith.constant 5.000000e-01 : f32
    %249 = vector.broadcast %cst_104 : f32 to vector<8x32xf32>
    %250 = arith.mulf %249, %248 : vector<8x32xf32>
    %cst_105 = arith.constant 5.000000e-01 : f32
    %251 = vector.broadcast %cst_105 : f32 to vector<8x32xf32>
    %252 = arith.addf %250, %251 : vector<8x32xf32>
    %253 = vector.extract_strided_slice %242 {offsets = [0, 64], sizes = [8, 32], strides = [1, 1]} : vector<8x128xf32> to vector<8x32xf32>
    %254 = vector.extract_strided_slice %242 {offsets = [0, 96], sizes = [8, 32], strides = [1, 1]} : vector<8x128xf32> to vector<8x32xf32>
    %cst_106 = arith.constant 5.000000e-01 : f32
    %255 = vector.broadcast %cst_106 : f32 to vector<8x32xf32>
    %256 = arith.mulf %255, %254 : vector<8x32xf32>
    %cst_107 = arith.constant 5.000000e-01 : f32
    %257 = vector.broadcast %cst_107 : f32 to vector<8x32xf32>
    %258 = arith.addf %256, %257 : vector<8x32xf32>
    %259 = arith.mulf %247, %230 : vector<8x32xf32>
    %260 = arith.mulf %252, %253 : vector<8x32xf32>
    %261 = arith.addf %259, %260 : vector<8x32xf32>
    %262 = math.tanh %261 : vector<8x32xf32>
    %263 = arith.mulf %258, %262 : vector<8x32xf32>
    %264 = arith.index_cast %c7_i32 : i32 to index
    %c0_108 = arith.constant 0 : index
    %c0_109 = arith.constant 0 : index
    %265 = vector.load %arg5[%264, %c0_108, %c0_109] : memref<8x8x32xf32, #tpu.memory_space<vmem>>, vector<1x8x32xf32>
    %266 = vector.shape_cast %265 : vector<1x8x32xf32> to vector<8x32xf32>
    %267 = vector.shape_cast %263 : vector<8x32xf32> to vector<1x8x32xf32>
    tpu.vector_store %arg5[%264, %c0_108, %c0_109], %267 {strides = array<i32>} : memref<8x8x32xf32, #tpu.memory_space<vmem>>, vector<1x8x32xf32>,
    %c8_i32 = arith.constant 8 : i32
    %c0_110 = arith.constant 0 : index
    %c0_111 = arith.constant 0 : index
    %c0_112 = arith.constant 0 : index
    %268 = vector.load %arg8[%c0_110, %c0_111, %c0_112] : memref<1x8x32xf32, #tpu.memory_space<vmem>>, vector<1x8x32xf32>
    %269 = vector.shape_cast %268 : vector<1x8x32xf32> to vector<8x32xf32>
    %270 = vector.shape_cast %263 : vector<8x32xf32> to vector<1x8x32xf32>
    tpu.vector_store %arg8[%c0_110, %c0_111, %c0_112], %270 {strides = array<i32>} : memref<1x8x32xf32, #tpu.memory_space<vmem>>, vector<1x8x32xf32>,
    %c0_113 = arith.constant 0 : index
    %c0_114 = arith.constant 0 : index
    %c0_115 = arith.constant 0 : index
    %271 = vector.load %arg9[%c0_113, %c0_114, %c0_115] : memref<1x8x32xf32, #tpu.memory_space<vmem>>, vector<1x8x32xf32>
    %272 = vector.shape_cast %271 : vector<1x8x32xf32> to vector<8x32xf32>
    %273 = vector.shape_cast %261 : vector<8x32xf32> to vector<1x8x32xf32>
    tpu.vector_store %arg9[%c0_113, %c0_114, %c0_115], %273 {strides = array<i32>} : memref<1x8x32xf32, #tpu.memory_space<vmem>>, vector<1x8x32xf32>,
    %c0_i32_116 = arith.constant 0 : i32
    %274 = arith.cmpi eq, %arg0, %c0_i32_116 : i32
    %275 = arith.extui %274 : i1 to i32
    %c0_i32_117 = arith.constant 0 : i32
    %276 = arith.cmpi ne, %275, %c0_i32_117 : i32
    scf.if %276 {
      %c0_118 = arith.constant 0 : index
      %c0_119 = arith.constant 0 : index
      %c0_120 = arith.constant 0 : index
      %277 = vector.load %arg8[%c0_118, %c0_119, %c0_120] : memref<1x8x32xf32, #tpu.memory_space<vmem>>, vector<1x8x32xf32>
      %c0_121 = arith.constant 0 : index
      %c0_122 = arith.constant 0 : index
      %c0_123 = arith.constant 0 : index
      %278 = vector.load %arg6[%c0_121, %c0_122, %c0_123] : memref<1x8x32xf32, #tpu.memory_space<vmem>>, vector<1x8x32xf32>
      tpu.vector_store %arg6[%c0_121, %c0_122, %c0_123], %277 {strides = array<i32>} : memref<1x8x32xf32, #tpu.memory_space<vmem>>, vector<1x8x32xf32>,
      %c0_124 = arith.constant 0 : index
      %c0_125 = arith.constant 0 : index
      %c0_126 = arith.constant 0 : index
      %279 = vector.load %arg9[%c0_124, %c0_125, %c0_126] : memref<1x8x32xf32, #tpu.memory_space<vmem>>, vector<1x8x32xf32>
      %c0_127 = arith.constant 0 : index
      %c0_128 = arith.constant 0 : index
      %c0_129 = arith.constant 0 : index
      %280 = vector.load %arg7[%c0_127, %c0_128, %c0_129] : memref<1x8x32xf32, #tpu.memory_space<vmem>>, vector<1x8x32xf32>
      tpu.vector_store %arg7[%c0_127, %c0_128, %c0_129], %279 {strides = array<i32>} : memref<1x8x32xf32, #tpu.memory_space<vmem>>, vector<1x8x32xf32>,
    } else {
    }
    return
  }
  func.func @transform_0(%arg0: i32) -> (i32, i32, i32) {
    %c0_i32 = arith.constant 0 : i32
    %c0_i32_0 = arith.constant 0 : i32
    %c0_i32_1 = arith.constant 0 : i32
    return %arg0, %c0_i32, %c0_i32_0 : i32, i32, i32
  }
  func.func @transform_1(%arg0: i32) -> (i32, i32, i32) {
    %c0_i32 = arith.constant 0 : i32
    %c0_i32_0 = arith.constant 0 : i32
    %c0_i32_1 = arith.constant 0 : i32
    %c0_i32_2 = arith.constant 0 : i32
    return %c0_i32, %c0_i32_0, %c0_i32_1 : i32, i32, i32
  }
  func.func @transform_2(%arg0: i32) -> (i32, i32, i32) {
    %c0_i32 = arith.constant 0 : i32
    %c0_i32_0 = arith.constant 0 : i32
    %c0_i32_1 = arith.constant 0 : i32
    %c0_i32_2 = arith.constant 0 : i32
    return %c0_i32, %c0_i32_0, %c0_i32_1 : i32, i32, i32
  }
  func.func @transform_3(%arg0: i32) -> (i32, i32, i32) {
    %c0_i32 = arith.constant 0 : i32
    %c0_i32_0 = arith.constant 0 : i32
    %c0_i32_1 = arith.constant 0 : i32
    %c0_i32_2 = arith.constant 0 : i32
    return %c0_i32, %c0_i32_0, %c0_i32_1 : i32, i32, i32
  }
  func.func @transform_4(%arg0: i32) -> (i32, i32, i32) {
    %c0_i32 = arith.constant 0 : i32
    %c0_i32_0 = arith.constant 0 : i32
    %c0_i32_1 = arith.constant 0 : i32
    return %arg0, %c0_i32, %c0_i32_0 : i32, i32, i32
  }
  func.func @transform_5(%arg0: i32) -> (i32, i32, i32) {
    %c0_i32 = arith.constant 0 : i32
    %c0_i32_0 = arith.constant 0 : i32
    %c0_i32_1 = arith.constant 0 : i32
    %c0_i32_2 = arith.constant 0 : i32
    return %c0_i32, %c0_i32_0, %c0_i32_1 : i32, i32, i32
  }
  func.func @transform_6(%arg0: i32) -> (i32, i32, i32) {
    %c0_i32 = arith.constant 0 : i32
    %c0_i32_0 = arith.constant 0 : i32
    %c0_i32_1 = arith.constant 0 : i32
    %c0_i32_2 = arith.constant 0 : i32
    return %c0_i32, %c0_i32_0, %c0_i32_1 : i32, i32, i32
  }
}

</mosaic_0001>

<bundles_post_ra>
// kernel: lstm_forward.1
= control target key start
LH: loop header
LB: loop body
LE: loop exit
PB: predicated region body
PF: predicated region fallthrough
CT: control target
= control target key end

     0   :  { %vm48_vm0 = vcmask 130048   ;;  %v1284_v0 = vmov 0.0|0.0   ;;  %vm1285_vm1 = vmmov 0   ;;  %v1286_v4 = vmov 0.0   ;;  %s1287_s13 = smov 96   ;;  %s1537_s1 = inlined_call_operand.vmem [shape: f32[1,16,128], index: 1, kind: input, shape index: {}]   ;;  %s1538_s2 = inlined_call_operand.vmem [shape: f32[1,32,128], index: 2, kind: input, shape index: {}]   ;;  %s1539_s0 = inlined_call_operand.vmem [shape: f32[8,8,16], index: 0, kind: input, shape index: {}]   ;;  %s1540_s3 = inlined_call_operand.vmem [shape: f32[1,1,128], index: 3, kind: input, shape index: {}]   ;;  %s1541_s4 = inlined_call_operand.vmem [shape: f32[8,8,32], index: 4, kind: output, shape index: {0}]   ;;  %s1542_s6 = inlined_call_operand.vmem [shape: f32[1,8,32], index: 6, kind: output, shape index: {2}]   ;;  %s1543_s5 = inlined_call_operand.vmem [shape: f32[1,8,32], index: 5, kind: output, shape index: {1}]  }
   0x1   :  { %1199 = vmatprep.subr.bf16.mxu1 %v1284_v0  ;;  %v27_v1 = vld [vmem:[%s1537_s1] sm:$0xff]  ;;  %v28_v2 = vld [vmem:[%s1537_s1 + $0x8] sm:$0xff]  ;;  %1115 = vmatprep.mubr.msk.f32.mxu1 %vm1285_vm1, %v1286_v4  ;;  %vm24_vm2 = vcmask 261120   ;;  %v31_v9 = vld [vmem:[%s1538_s2 + $0x10] sm:$0xff] }
   0x2   :  { %v29_v3 = vld [vmem:[%s1538_s2] sm:$0xff]  ;;  %v1195_v5 = vpack.c.bf16 %v28_v2, %v27_v1  ;;  %v30_v6 = vld [vmem:[%s1538_s2 + $0x8] sm:$0xff]  ;;  %25 = vst.msk [vmem:[#allocation2] sm:$0xff] %vm24_vm2, %v1286_v4  ;;  %26 = vst.msk [vmem:[#allocation3] sm:$0xff] %vm24_vm2, %v1286_v4 }
   0x3   :  { %v34_v7 = vld [vmem:[%s1539_s0] sm:$0xff]  ;;  %v1346_v8 = vpack.c.bf16 %v30_v6, %v29_v3  ;;  %v32_v10 = vld [vmem:[%s1538_s2 + $0x18] sm:$0xff]  ;;  %v35_v11 = vld [vmem:[%s1539_s0 + $0x8] sm:$0xff] }
   0x4   :  { %1095 = vmatprep.mubr.msk.f32.mxu0 %vm48_vm0, %v34_v7  ;;  %1196 = vmatprep.subr.bf16.mxu0 %v1195_v5  ;;  %v1359_v12 = vpack.c.bf16 %v32_v10, %v31_v9  ;;  %v1380_v14 = vld [vmem:[%s1540_s3] ss:$0 sm:$0xff]  ;;  %s1288_s3 = smov 32   ;;  %v36_v46 = vld [vmem:[%s1539_s0 + $0x10] sm:$0xff]  ;;  %v37_v47 = vld [vmem:[%s1539_s0 + $0x18] sm:$0xff] }
   0x5   :  { %1201 = vmatpush3.bf16.msra.mxu1 %v1346_v8  ;;  %1198 = vmatpush3.bf16.msra.mxu0 %v1195_v5  ;;  %v38_v48 = vld [vmem:[%s1539_s0 + $0x20] sm:$0xff]  ;;  %v39_v49 = vld [vmem:[%s1539_s0 + $0x28] sm:$0xff]  ;;  %v40_v50 = vld [vmem:[%s1539_s0 + $0x30] sm:$0xff] }
   0x6   :  { %1202 = vmatprep.subr.bf16.mxu1 %v1284_v0  ;;  %1211 = vmatprep.subr.bf16.mxu0 %v1284_v0  ;;  %v41_v51 = vld [vmem:[%s1539_s0 + $0x38] sm:$0xff] }
   0x8   :  { %1096 = vmatmul.mubr.msk.f32.vlgmr.msra.gmra.mrb[0].mxu0 %vm48_vm0, %v35_v11 }
   0x9   :  { %1204 = vmatpush3.bf16.msra.mxu1 %v1359_v12  ;;  %v186_v13 = vld [vmem:[#allocation2] sm:$0xff]  ;;  %1213 = vmatpush3.bf16.msra.mxu0 %v1346_v8  ;;  %v187_v26 = vld [vmem:[#allocation3] sm:$0xff] }
   0xa   :  { %1205 = vmatprep.subr.bf16.mxu1 %v1284_v0  ;;  %1214 = vmatprep.subr.bf16.mxu0 %v1284_v0 }
   0xb   :  { %1098 = vmatprep.mubr.msk.f32.mxu0 %vm48_vm0, %v36_v46 }
   0xc   :  { %1116 = vmatmul.mubr.msk.f32.vlgmr.msra.gmra.mrb[0].mxu1 %vm24_vm2, %v186_v13  ;;  %1099 = vmatmul.mubr.msk.f32.gmra.mrb[2].mxu0 %vm48_vm0, %v37_v47 }
   0xd   :  { %1207 = vmatpush3.bf16.msra.mxu1 %v1346_v8  ;;  %1126 = vmatprep.mubr.msk.f32.mxu1 %vm1285_vm1, %v1286_v4 }
   0xe   :  { %1208 = vmatprep.subr.bf16.mxu1 %v1284_v0  ;;  %1216 = vmatpush3.bf16.msra.mxu0 %v1359_v12 }
   0xf   :  { %1223 = vmatprep.subr.bf16.mxu0 %v1284_v0  ;;  %1101 = vmatprep.mubr.msk.f32.mxu0 %vm48_vm0, %v38_v48 }
  0x10   :  { %1102 = vmatmul.mubr.msk.f32.gmra.mrb[4].mxu0 %vm48_vm0, %v39_v49 }
  0x11   :  { %1210 = vmatpush3.bf16.msra.mxu1 %v1359_v12  ;;  %1104 = vmatprep.mubr.msk.f32.mxu0 %vm48_vm0, %v40_v50 }
  0x12   :  { %1217 = vmatprep.subr.bf16.mxu1 %v1284_v0 }
  0x14   :  { %1105 = vmatmul.mubr.msk.f32.gmra.mrb[6].mxu0 %vm48_vm0, %v41_v51 }
  0x15   :  { %1137 = vmatprep.mubr.msk.f32.mxu0 %vm1285_vm1, %v1286_v4 }
  0xdb   :  { %v1097_v15 = vpop.f32.mrb[0].mxu0 }
  0xdc   :  { %v139_v16 = vpop.f32.mrb[1].mxu0  ;;  %v145_v34 = vadd.f32 %v1097_v15, %v1380_v14 }
  0xdd   :  { %v140_v17 = vadd.f32 %v1380_v14, %v139_v16 }
  0xdf   :  { %v259_v18 = vpop.f32.mrb[0].mxu1  ;;  %v1100_v55 = vpop.f32.mrb[2].mxu0 }
  0xe0   :  { %v263_v19 = vadd.f32 %v259_v18, %v140_v17  ;;  %v1117_v20 = vpop.f32.mrb[1].mxu1  ;;  %v149_v56 = vpop.f32.mrb[3].mxu0 }
  0xe1   :  { %v150_v62 = vadd.f32 %v1380_v14, %v149_v56 }
  0xe2   :  { %1252 = vtanh.f32 %v263_v19  ;;  %v155_v19 = vadd.f32 %v1100_v55, %v1380_v14 }
  0xe3   :  { %v1429_v57 = vpop.f32.mrb[4].mxu0 }
  0xe4   :  { %v1431_v58 = vpop.f32.mrb[5].mxu0  ;;  %v165_v51 = vadd.f32 %v1429_v57, %v1380_v14 }
  0xe7   :  { %v1433_v59 = vpop.f32.mrb[6].mxu0 }
  0xe8   :  { %v1435_v60 = vpop.f32.mrb[7].mxu0 }
  0xec   :  { %v1253_v21 = vpop.eup %1252 }
  0xed   :  { %269 = vrot.lane.b32.xlu0 %v1253_v21, %s1287_s13  ;;  %v265_v22 = vmul.f32 0.5, %v1253_v21 }
  0xef   :  { %v266_v23 = vadd.f32 0.5, %v265_v22 }
  0xf1   :  { %v267_v27 = vmul.f32 %v266_v23, %v187_v26 }
 0x15f   :  { %v270_v24 = vpop.permute.xlu0 %269 }
 0x160   :  { %v272_v25 = vmul.f32 %v270_v24, %v266_v23 }
 0x162   :  { %274 = vrot.lane.b32.xlu0 %v272_v25, %s1287_s13 }
 0x1d4   :  { %v275_v28 = vpop.permute.xlu0 %274 }
 0x1d5   :  { %v277_v29 = vadd.f32 %v275_v28, %v267_v27 }
 0x1d7   :  { %1254 = vtanh.f32 %v277_v29 }
 0x1e1   :  { %v1255_v30 = vpop.eup %1254 }
 0x1e2   :  { %280 = vrot.lane.b32.xlu1 %v1255_v30, %s1287_s13 }
 0x254   :  { %v281_v31 = vpop.permute.xlu1 %280 }
 0x255   :  { %v283_v32 = vmul.f32 %v281_v31, %v266_v23 }
 0x257   :  { %285 = vrot.lane.b32.xlu1 %v283_v32, %s1288_s3 }
 0x2c9   :  { %v286_v33 = vpop.permute.xlu1 %285 }
 0x2ca   :  { %288 = vst.msk [vmem:[%s1541_s4] sm:$0xff] %vm24_vm2, %v286_v33  ;;  %1127 = vmatmul.mubr.msk.f32.vlgmr.msra.gmra.mrb[2].mxu1 %vm24_vm2, %v286_v33 }
 0x2cb   :  { %1219 = vmatpush3.bf16.msra.mxu1 %v1346_v8  ;;  %1148 = vmatprep.mubr.msk.f32.mxu1 %vm1285_vm1, %v1286_v4 }
 0x2cc   :  { %1220 = vmatprep.subr.bf16.mxu1 %v1284_v0 }
 0x2cf   :  { %1222 = vmatpush3.bf16.msra.mxu1 %v1359_v12 }
 0x2d0   :  { %1229 = vmatprep.subr.bf16.mxu1 %v1284_v0 }
 0x39d   :  { %v359_v35 = vpop.f32.mrb[2].mxu1 }
 0x39e   :  { %v363_v36 = vadd.f32 %v359_v35, %v145_v34  ;;  %v1128_v37 = vpop.f32.mrb[3].mxu1  ;;  %v160_v35 = vadd.f32 %v1380_v14, %v1431_v58 }
 0x3a0   :  { %1256 = vtanh.f32 %v363_v36 }
 0x3aa   :  { %v1257_v38 = vpop.eup %1256 }
 0x3ab   :  { %369 = vrot.lane.b32.xlu0 %v1257_v38, %s1287_s13  ;;  %v365_v39 = vmul.f32 0.5, %v1257_v38 }
 0x3ad   :  { %v366_v40 = vadd.f32 0.5, %v365_v39 }
 0x3af   :  { %v367_v43 = vmul.f32 %v366_v40, %v277_v29 }
 0x41d   :  { %v370_v41 = vpop.permute.xlu0 %369 }
 0x41e   :  { %v372_v42 = vmul.f32 %v370_v41, %v366_v40 }
 0x420   :  { %374 = vrot.lane.b32.xlu1 %v372_v42, %s1287_s13 }
 0x492   :  { %v375_v44 = vpop.permute.xlu1 %374 }
 0x493   :  { %v377_v45 = vadd.f32 %v375_v44, %v367_v43 }
 0x495   :  { %1258 = vtanh.f32 %v377_v45 }
 0x49f   :  { %v1259_v52 = vpop.eup %1258 }
 0x4a0   :  { %380 = vrot.lane.b32.xlu0 %v1259_v52, %s1287_s13 }
 0x512   :  { %v381_v53 = vpop.permute.xlu0 %380 }
 0x513   :  { %v383_v54 = vmul.f32 %v381_v53, %v366_v40 }
 0x515   :  { %385 = vrot.lane.b32.xlu1 %v383_v54, %s1288_s3 }
 0x587   :  { %v386_v61 = vpop.permute.xlu1 %385 }
 0x588   :  { %1028 = vst.msk [vmem:[%s1541_s4 + $0x8] sm:$0xff] %vm24_vm2, %v386_v61  ;;  %1138 = vmatmul.mubr.msk.f32.vlgmr.msra.gmra.mrb[8].mxu0 %vm24_vm2, %v386_v61 }
 0x589   :  { %1225 = vmatpush3.bf16.msra.mxu0 %v1346_v8  ;;  %1159 = vmatprep.mubr.msk.f32.mxu0 %vm1285_vm1, %v1286_v4 }
 0x58a   :  { %1226 = vmatprep.subr.bf16.mxu0 %v1284_v0 }
 0x58d   :  { %1228 = vmatpush3.bf16.msra.mxu0 %v1359_v12 }
 0x58e   :  { %1235 = vmatprep.subr.bf16.mxu0 %v1284_v0 }
 0x65b   :  { %v460_v63 = vpop.f32.mrb[8].mxu0 }
 0x65c   :  { %v464_v1 = vadd.f32 %v460_v63, %v150_v62  ;;  %v1139_v2 = vpop.f32.mrb[9].mxu0 }
 0x65d   :  { %v170_v2 = vadd.f32 %v1380_v14, %v1435_v60 }
 0x65e   :  { %1260 = vtanh.f32 %v464_v1 }
 0x668   :  { %v1261_v3 = vpop.eup %1260 }
 0x669   :  { %470 = vrot.lane.b32.xlu0 %v1261_v3, %s1287_s13  ;;  %v466_v5 = vmul.f32 0.5, %v1261_v3 }
 0x66b   :  { %v467_v6 = vadd.f32 0.5, %v466_v5 }
 0x66d   :  { %v468_v10 = vmul.f32 %v467_v6, %v377_v45 }
 0x6db   :  { %v471_v7 = vpop.permute.xlu0 %470 }
 0x6dc   :  { %v473_v9 = vmul.f32 %v471_v7, %v467_v6 }
 0x6de   :  { %475 = vrot.lane.b32.xlu1 %v473_v9, %s1287_s13 }
 0x750   :  { %v476_v11 = vpop.permute.xlu1 %475 }
 0x751   :  { %v478_v13 = vadd.f32 %v476_v11, %v468_v10 }
 0x753   :  { %1262 = vtanh.f32 %v478_v13 }
 0x75d   :  { %v1263_v15 = vpop.eup %1262 }
 0x75e   :  { %481 = vrot.lane.b32.xlu0 %v1263_v15, %s1287_s13 }
 0x7d0   :  { %v482_v16 = vpop.permute.xlu0 %481 }
 0x7d1   :  { %v484_v17 = vmul.f32 %v482_v16, %v467_v6 }
 0x7d3   :  { %486 = vrot.lane.b32.xlu1 %v484_v17, %s1288_s3 }
 0x845   :  { %v487_v18 = vpop.permute.xlu1 %486 }
 0x846   :  { %1030 = vst.msk [vmem:[%s1541_s4 + $0x10] sm:$0xff] %vm24_vm2, %v487_v18  ;;  %1149 = vmatmul.mubr.msk.f32.vlgmr.msra.gmra.mrb[4].mxu1 %vm24_vm2, %v487_v18 }
 0x847   :  { %1231 = vmatpush3.bf16.msra.mxu1 %v1346_v8  ;;  %1170 = vmatprep.mubr.msk.f32.mxu1 %vm1285_vm1, %v1286_v4 }
 0x848   :  { %1232 = vmatprep.subr.bf16.mxu1 %v1284_v0 }
 0x84b   :  { %1234 = vmatpush3.bf16.msra.mxu1 %v1359_v12 }
 0x84c   :  { %1241 = vmatprep.subr.bf16.mxu1 %v1284_v0 }
 0x919   :  { %v561_v20 = vpop.f32.mrb[4].mxu1 }
 0x91a   :  { %v565_v21 = vadd.f32 %v561_v20, %v155_v19  ;;  %v1150_v22 = vpop.f32.mrb[5].mxu1 }
 0x91c   :  { %1264 = vtanh.f32 %v565_v21  ;;  %v175_v21 = vadd.f32 %v1433_v59, %v1380_v14 }
 0x926   :  { %v1265_v23 = vpop.eup %1264 }
 0x927   :  { %571 = vrot.lane.b32.xlu0 %v1265_v23, %s1287_s13  ;;  %v567_v24 = vmul.f32 0.5, %v1265_v23 }
 0x929   :  { %v568_v25 = vadd.f32 0.5, %v567_v24 }
 0x92b   :  { %v569_v28 = vmul.f32 %v568_v25, %v478_v13 }
 0x999   :  { %v572_v26 = vpop.permute.xlu0 %571 }
 0x99a   :  { %v574_v27 = vmul.f32 %v572_v26, %v568_v25 }
 0x99c   :  { %576 = vrot.lane.b32.xlu1 %v574_v27, %s1287_s13 }
 0xa0e   :  { %v577_v29 = vpop.permute.xlu1 %576 }
 0xa0f   :  { %v579_v30 = vadd.f32 %v577_v29, %v569_v28 }
 0xa11   :  { %1266 = vtanh.f32 %v579_v30 }
 0xa1b   :  { %v1267_v31 = vpop.eup %1266 }
 0xa1c   :  { %582 = vrot.lane.b32.xlu0 %v1267_v31, %s1287_s13 }
 0xa8e   :  { %v583_v32 = vpop.permute.xlu0 %582 }
 0xa8f   :  { %v585_v33 = vmul.f32 %v583_v32, %v568_v25 }
 0xa91   :  { %587 = vrot.lane.b32.xlu1 %v585_v33, %s1288_s3 }
 0xb03   :  { %v588_v34 = vpop.permute.xlu1 %587 }
 0xb04   :  { %1032 = vst.msk [vmem:[%s1541_s4 + $0x18] sm:$0xff] %vm24_vm2, %v588_v34  ;;  %1160 = vmatmul.mubr.msk.f32.vlgmr.msra.gmra.mrb[10].mxu0 %vm24_vm2, %v588_v34 }
 0xb05   :  { %1237 = vmatpush3.bf16.msra.mxu0 %v1346_v8  ;;  %1181 = vmatprep.mubr.msk.f32.mxu0 %vm1285_vm1, %v1286_v4 }
 0xb06   :  { %1238 = vmatprep.subr.bf16.mxu0 %v1284_v0 }
 0xb09   :  { %1240 = vmatpush3.bf16.msra.mxu0 %v1359_v12 }
 0xbd7   :  { %v662_v36 = vpop.f32.mrb[10].mxu0 }
 0xbd8   :  { %v666_v37 = vadd.f32 %v662_v36, %v160_v35  ;;  %v1161_v38 = vpop.f32.mrb[11].mxu0 }
 0xbda   :  { %1268 = vtanh.f32 %v666_v37 }
 0xbe4   :  { %v1269_v39 = vpop.eup %1268 }
 0xbe5   :  { %672 = vrot.lane.b32.xlu0 %v1269_v39, %s1287_s13  ;;  %v668_v40 = vmul.f32 0.5, %v1269_v39 }
 0xbe7   :  { %v669_v41 = vadd.f32 0.5, %v668_v40 }
 0xbe9   :  { %v670_v44 = vmul.f32 %v669_v41, %v579_v30 }
 0xc57   :  { %v673_v42 = vpop.permute.xlu0 %672 }
 0xc58   :  { %v675_v43 = vmul.f32 %v673_v42, %v669_v41 }
 0xc5a   :  { %677 = vrot.lane.b32.xlu1 %v675_v43, %s1287_s13 }
 0xccc   :  { %v678_v45 = vpop.permute.xlu1 %677 }
 0xccd   :  { %v680_v46 = vadd.f32 %v678_v45, %v670_v44 }
 0xccf   :  { %1270 = vtanh.f32 %v680_v46 }
 0xcd9   :  { %v1271_v47 = vpop.eup %1270 }
 0xcda   :  { %683 = vrot.lane.b32.xlu0 %v1271_v47, %s1287_s13 }
 0xd4c   :  { %v684_v48 = vpop.permute.xlu0 %683 }
 0xd4d   :  { %v686_v49 = vmul.f32 %v684_v48, %v669_v41 }
 0xd4f   :  { %688 = vrot.lane.b32.xlu1 %v686_v49, %s1288_s3 }
 0xdc1   :  { %v689_v50 = vpop.permute.xlu1 %688 }
 0xdc2   :  { %1034 = vst.msk [vmem:[%s1541_s4 + $0x20] sm:$0xff] %vm24_vm2, %v689_v50  ;;  %1171 = vmatmul.mubr.msk.f32.vlgmr.msra.gmra.mrb[6].mxu1 %vm24_vm2, %v689_v50 }
 0xdc3   :  { %1243 = vmatpush3.bf16.msra.mxu1 %v1346_v8  ;;  %1192 = vmatprep.mubr.msk.f32.mxu1 %vm1285_vm1, %v1286_v4 }
 0xdc4   :  { %1244 = vmatprep.subr.bf16.mxu1 %v1284_v0 }
 0xdc7   :  { %1246 = vmatpush3.bf16.msra.mxu1 %v1359_v12 }
 0xe95   :  { %v763_v52 = vpop.f32.mrb[6].mxu1 }
 0xe96   :  { %v767_v53 = vadd.f32 %v763_v52, %v165_v51  ;;  %v1172_v54 = vpop.f32.mrb[7].mxu1 }
 0xe98   :  { %1272 = vtanh.f32 %v767_v53 }
 0xea2   :  { %v1273_v55 = vpop.eup %1272 }
 0xea3   :  { %773 = vrot.lane.b32.xlu0 %v1273_v55, %s1287_s13  ;;  %v769_v56 = vmul.f32 0.5, %v1273_v55 }
 0xea5   :  { %v770_v58 = vadd.f32 0.5, %v769_v56 }
 0xea7   :  { %v771_v4 = vmul.f32 %v770_v58, %v680_v46 }
 0xf15   :  { %v774_v8 = vpop.permute.xlu0 %773 }
 0xf16   :  { %v776_v61 = vmul.f32 %v774_v8, %v770_v58 }
 0xf18   :  { %778 = vrot.lane.b32.xlu1 %v776_v61, %s1287_s13 }
 0xf8a   :  { %v779_v0 = vpop.permute.xlu1 %778 }
 0xf8b   :  { %v781_v62 = vadd.f32 %v779_v0, %v771_v4 }
 0xf8d   :  { %1274 = vtanh.f32 %v781_v62 }
 0xf97   :  { %v1275_v12 = vpop.eup %1274 }
 0xf98   :  { %784 = vrot.lane.b32.xlu0 %v1275_v12, %s1287_s13 }
0x100a   :  { %v785_v57 = vpop.permute.xlu0 %784 }
0x100b   :  { %v787_v63 = vmul.f32 %v785_v57, %v770_v58 }
0x100d   :  { %789 = vrot.lane.b32.xlu1 %v787_v63, %s1288_s3 }
0x107f   :  { %v790_v1 = vpop.permute.xlu1 %789 }
0x1080   :  { %1036 = vst.msk [vmem:[%s1541_s4 + $0x28] sm:$0xff] %vm24_vm2, %v790_v1  ;;  %1182 = vmatmul.mubr.msk.f32.vlgmr.msra.gmra.mrb[12].mxu0 %vm24_vm2, %v790_v1 }
0x1153   :  { %v864_v3 = vpop.f32.mrb[12].mxu0 }
0x1154   :  { %v868_v5 = vadd.f32 %v864_v3, %v170_v2  ;;  %v1183_v6 = vpop.f32.mrb[13].mxu0 }
0x1156   :  { %1276 = vtanh.f32 %v868_v5 }
0x1160   :  { %v1277_v7 = vpop.eup %1276 }
0x1161   :  { %874 = vrot.lane.b32.xlu0 %v1277_v7, %s1287_s13  ;;  %v870_v9 = vmul.f32 0.5, %v1277_v7 }
0x1163   :  { %v871_v10 = vadd.f32 0.5, %v870_v9 }
0x1165   :  { %v872_v15 = vmul.f32 %v871_v10, %v781_v62 }
0x11d3   :  { %v875_v11 = vpop.permute.xlu0 %874 }
0x11d4   :  { %v877_v13 = vmul.f32 %v875_v11, %v871_v10 }
0x11d6   :  { %879 = vrot.lane.b32.xlu1 %v877_v13, %s1287_s13 }
0x1248   :  { %v880_v16 = vpop.permute.xlu1 %879 }
0x1249   :  { %v882_v17 = vadd.f32 %v880_v16, %v872_v15 }
0x124b   :  { %1278 = vtanh.f32 %v882_v17 }
0x1255   :  { %v1279_v18 = vpop.eup %1278 }
0x1256   :  { %885 = vrot.lane.b32.xlu0 %v1279_v18, %s1287_s13 }
0x12c8   :  { %v886_v60 = vpop.permute.xlu0 %885 }
0x12c9   :  { %v888_v19 = vmul.f32 %v886_v60, %v871_v10 }
0x12cb   :  { %890 = vrot.lane.b32.xlu1 %v888_v19, %s1288_s3 }
0x133d   :  { %v891_v20 = vpop.permute.xlu1 %890 }
0x133e   :  { %1038 = vst.msk [vmem:[%s1541_s4 + $0x30] sm:$0xff] %vm24_vm2, %v891_v20  ;;  %1193 = vmatmul.mubr.msk.f32.vlgmr.msra.gmra.mrb[8].mxu1 %vm24_vm2, %v891_v20 }
0x1411   :  { %v965_v22 = vpop.f32.mrb[8].mxu1 }
0x1412   :  { %v969_v23 = vadd.f32 %v965_v22, %v175_v21  ;;  %v1194_v24 = vpop.f32.mrb[9].mxu1 }
0x1414   :  { %1280 = vtanh.f32 %v969_v23 }
0x141e   :  { %v1281_v25 = vpop.eup %1280 }
0x141f   :  { %975 = vrot.lane.b32.xlu0 %v1281_v25, %s1287_s13  ;;  %v971_v26 = vmul.f32 0.5, %v1281_v25 }
0x1421   :  { %v972_v27 = vadd.f32 0.5, %v971_v26 }
0x1423   :  { %v973_v30 = vmul.f32 %v972_v27, %v882_v17 }
0x1491   :  { %v976_v28 = vpop.permute.xlu0 %975 }
0x1492   :  { %v978_v29 = vmul.f32 %v976_v28, %v972_v27 }
0x1494   :  { %980 = vrot.lane.b32.xlu1 %v978_v29, %s1287_s13 }
0x1506   :  { %v981_v31 = vpop.permute.xlu1 %980 }
0x1507   :  { %v983_v32 = vadd.f32 %v981_v31, %v973_v30 }
0x1509   :  { %1282 = vtanh.f32 %v983_v32  ;;  %997 = vst.msk [vmem:[#allocation3] sm:$0xff] %vm24_vm2, %v983_v32 }
0x1510   :  { %v1003_v14 = vld [vmem:[#allocation3] sm:$0xff] }
0x1511   :  { %1004 = vst.msk [vmem:[%s1542_s6] sm:$0xff] %vm24_vm2, %v1003_v14 }
0x1513   :  { %v1283_v59 = vpop.eup %1282 }
0x1514   :  { %986 = vrot.lane.b32.xlu0 %v1283_v59, %s1287_s13 }
0x1586   :  { %v987_v33 = vpop.permute.xlu0 %986 }
0x1587   :  { %v989_v34 = vmul.f32 %v987_v33, %v972_v27 }
0x1589   :  { %991 = vrot.lane.b32.xlu1 %v989_v34, %s1288_s3 }
0x15fb   :  { %v992_v35 = vpop.permute.xlu1 %991 }
0x15fc   :  { %1040 = vst.msk [vmem:[%s1541_s4 + $0x38] sm:$0xff] %vm24_vm2, %v992_v35  ;;  %996 = vst.msk [vmem:[#allocation2] sm:$0xff] %vm24_vm2, %v992_v35 }
0x1603   :  { %v1001_v36 = vld [vmem:[#allocation2] sm:$0xff] }
0x1604   :  { %1002 = vst.msk [vmem:[%s1543_s5] sm:$0xff] %vm24_vm2, %v1001_v36 }

</bundles_post_ra>
